<compile_context>
chip_gen: v5e
topology: v5e:2x2
jax: 0.10.0
libtpu: 0.0.40
codegen_flags: <defaults>
</compile_context>

<pallas_src>
import functools

import jax
import jax.numpy as jnp
import numpy as np
from jax.experimental import pallas as pl
from jax.experimental.pallas import tpu as pltpu


def _round_up(n, m):
    return ((n + m - 1) // m) * m


def _row_pack(dtype):
    # Sublane packing factor: f32 -> 8, bf16 -> 16, int8/fp8 -> 32.
    return max(8, 32 // jnp.dtype(dtype).itemsize)


def _tile_rows(R, D, dtype, *, target_tile_bytes=4 << 20):
    """Rows per block: byte-budgeted tile with dtype-aware sublane rounding,
    capped so the row grid keeps >= 4 blocks when R is large enough (so the
    'parallel' axis can be sharded across 2 TensorCores on v7x and the
    pipeline has blocks to overlap)."""
    pack = _row_pack(dtype)
    row_bytes = D * jnp.dtype(dtype).itemsize
    tb = max(pack, target_tile_bytes // max(row_bytes, 1))
    tb = _round_up(tb, pack)
    r_pad = _round_up(R, pack)
    if r_pad >= 4 * pack:
        tb = min(tb, _round_up(pl.cdiv(r_pad, 4), pack))
    return min(tb, r_pad)


# ---------------------------------------------------------------------------
# Standalone LayerNorm kernel (generic PreNorm path)
# ---------------------------------------------------------------------------

def _layernorm_kernel(x_ref, g_ref, b_ref, o_ref, *, eps):
    # x_ref block: (TB, D) rows; normalize each row over the lane axis.
    x = x_ref[...].astype(jnp.float32)                        # (TB, D)
    d = x.shape[-1]
    mean = jnp.sum(x, axis=-1, keepdims=True) * (1.0 / d)     # (TB, 1)
    xc = x - mean
    var = jnp.sum(xc * xc, axis=-1, keepdims=True) * (1.0 / d)
    inv = jax.lax.rsqrt(var + eps)                            # EUP slot, cheap
    y = xc * inv * g_ref[...].astype(jnp.float32) + b_ref[...].astype(jnp.float32)
    o_ref[...] = y.astype(o_ref.dtype)


def layer_norm(x, gamma, beta, *, eps=1e-5, target_tile_bytes=4 << 20):
    """LayerNorm over the last dim of x (any leading shape)."""
    orig_shape = x.shape
    D = orig_shape[-1]
    R = int(np.prod(orig_shape[:-1]))
    x2 = x.reshape(R, D)

    TB = _tile_rows(R, D, x.dtype, target_tile_bytes=target_tile_bytes)
    grid = (pl.cdiv(R, TB),)

    itemsize = jnp.dtype(x.dtype).itemsize
    tile_bytes = TB * D * itemsize
    # 2x double-buffered input + 2x double-buffered output + f32 temps + slack.
    vmem_limit = min(48 << 20, 4 * tile_bytes + 3 * TB * D * 4 + (4 << 20))

    normed = pl.pallas_call(
        functools.partial(_layernorm_kernel, eps=eps),
        out_shape=jax.ShapeDtypeStruct((R, D), x.dtype),
        grid_spec=pltpu.PrefetchScalarGridSpec(
            num_scalar_prefetch=0,
            grid=grid,
            in_specs=[
                pl.BlockSpec((TB, D), lambda i: (i, 0)),   # x row slab
                pl.BlockSpec((1, D), lambda i: (0, 0)),    # gamma (resident)
                pl.BlockSpec((1, D), lambda i: (0, 0)),    # beta  (resident)
            ],
            out_specs=pl.BlockSpec((TB, D), lambda i: (i, 0)),
        ),
        compiler_params=pltpu.CompilerParams(
            dimension_semantics=("parallel",),
            vmem_limit_bytes=int(vmem_limit)),
    )(x2, gamma.reshape(1, D), beta.reshape(1, D))

    return normed.reshape(orig_shape)


def pre_norm(x, gamma, beta, fn=None, *, eps=1e-5, target_tile_bytes=4 << 20):
    """Generic PreNorm forward: fn(LayerNorm(x)).  x: (..., D), gamma/beta: (D,)."""
    normed = layer_norm(x, gamma, beta, eps=eps,
                        target_tile_bytes=target_tile_bytes)
    # TODO(synk): `fn` is an arbitrary wrapped nn.Module in the PyTorch code;
    # here it is applied as a plain JAX callable (use pre_norm_linear below
    # for the fused path when fn is a Linear).
    return fn(normed) if fn is not None else normed


# ---------------------------------------------------------------------------
# Fused LayerNorm + Linear kernel (PreNorm where fn is a Linear layer)
# ---------------------------------------------------------------------------

def _ln_linear_kernel(x_ref, g_ref, b_ref, w_ref, fb_ref, o_ref, xn_ref, *, eps):
    # Grid: (row_blocks, out_feature_blocks); normalized x is computed once
    # per row block (j == 0) into VMEM scratch and re-used for every j.
    j = pl.program_id(1)

    @pl.when(j == 0)
    def _():
        x = x_ref[...].astype(jnp.float32)                    # (TB, D)
        d = x.shape[-1]
        mean = jnp.sum(x, axis=-1, keepdims=True) * (1.0 / d)
        xc = x - mean
        var = jnp.sum(xc * xc, axis=-1, keepdims=True) * (1.0 / d)
        inv = jax.lax.rsqrt(var + eps)
        y = xc * inv * g_ref[...].astype(jnp.float32) + b_ref[...].astype(jnp.float32)
        xn_ref[...] = y.astype(xn_ref.dtype)

    acc = jnp.dot(xn_ref[...], w_ref[...].astype(xn_ref.dtype),
                  preferred_element_type=jnp.float32)          # (TB, TN)
    o_ref[...] = (acc + fb_ref[...].astype(jnp.float32)).astype(o_ref.dtype)


def pre_norm_linear(x, gamma, beta, w, bias, *, eps=1e-5,
                    target_tile_bytes=2 << 20):
    """Fused PreNorm + Linear: (LayerNorm(x) @ w + bias), no HBM round trip
    for the normalized activations.  x: (..., D), w: (D, H), bias: (H,)."""
    orig_shape = x.shape
    D = orig_shape[-1]
    H = w.shape[-1]
    R = int(np.prod(orig_shape[:-1]))
    x2 = x.reshape(R, D)

    TB = _tile_rows(R, D, x.dtype, target_tile_bytes=target_tile_bytes)
    TN = min(H, 512) if H % 128 == 0 else H     # full extent if not 128-aligned
    grid = (pl.cdiv(R, TB), pl.cdiv(H, TN))

    out_dtype = x.dtype
    isz = jnp.dtype(x.dtype).itemsize
    x_tile = TB * D * isz
    w_tile = D * TN * jnp.dtype(w.dtype).itemsize
    o_tile = TB * TN * jnp.dtype(out_dtype).itemsize
    xn_tile = TB * D * isz
    vmem_limit = min(
        48 << 20,
        2 * (x_tile + w_tile + o_tile) + xn_tile + 3 * TB * D * 4 + (4 << 20))

    out = pl.pallas_call(
        functools.partial(_ln_linear_kernel, eps=eps),
        out_shape=jax.ShapeDtypeStruct((R, H), out_dtype),
        grid_spec=pltpu.PrefetchScalarGridSpec(
            num_scalar_prefetch=0,
            grid=grid,
            in_specs=[
                pl.BlockSpec((TB, D), lambda i, j: (i, 0)),   # x row slab
                pl.BlockSpec((1, D), lambda i, j: (0, 0)),    # gamma (resident)
                pl.BlockSpec((1, D), lambda i, j: (0, 0)),    # beta  (resident)
                pl.BlockSpec((D, TN), lambda i, j: (0, j)),   # weight column block
                pl.BlockSpec((1, TN), lambda i, j: (0, j)),   # linear bias
            ],
            out_specs=pl.BlockSpec((TB, TN), lambda i, j: (i, j)),
            scratch_shapes=[pltpu.VMEM((TB, D), x.dtype)],    # normalized x
        ),
        compiler_params=pltpu.CompilerParams(
            dimension_semantics=("parallel", "arbitrary"),
            vmem_limit_bytes=int(vmem_limit)),
    )(x2, gamma.reshape(1, D), beta.reshape(1, D), w, bias.reshape(1, H))

    return out.reshape(orig_shape[:-1] + (H,))


# ---------------------------------------------------------------------------
# Reference + test
# ---------------------------------------------------------------------------

def pre_norm_ref(x, gamma, beta, fn=None, eps=1e-5):
    mean = jnp.mean(x, axis=-1, keepdims=True)
    var = jnp.mean((x - mean) ** 2, axis=-1, keepdims=True)
    y = (x - mean) / jnp.sqrt(var + eps) * gamma + beta
    return fn(y) if fn is not None else y


if __name__ == "__main__":
    # Small shapes consistent with the module: batch=2, seq=8, dim=128.
    B, N, D = 2, 8, 128
    H = 32

    key = jax.random.PRNGKey(0)
    kx, kg, kb, kw, kwb = jax.random.split(key, 5)

    x = jax.random.normal(kx, (B, N, D), dtype=jnp.float32)
    gamma = 1.0 + 0.1 * jax.random.normal(kg, (D,), dtype=jnp.float32)
    beta = 0.1 * jax.random.normal(kb, (D,), dtype=jnp.float32)

    # Example wrapped `fn` (a small linear).
    wf = jax.random.normal(kw, (D, H), dtype=jnp.float32) * 0.1
    bf = jax.random.normal(kwb, (H,), dtype=jnp.float32) * 0.1
    fn = lambda y: y @ wf + bf

    ref = jax.block_until_ready(pre_norm_ref(x, gamma, beta, fn))

    # Path 1: generic PreNorm (Pallas LayerNorm, arbitrary fn applied in JAX).
    out = jax.block_until_ready(pre_norm(x, gamma, beta, fn))
    np.testing.assert_allclose(np.asarray(out), np.asarray(ref),
                               rtol=2e-5, atol=2e-5)

    # Path 2: fused PreNorm + Linear (fn is a Linear layer).
    out_fused = jax.block_until_ready(pre_norm_linear(x, gamma, beta, wf, bf))
    np.testing.assert_allclose(np.asarray(out_fused), np.asarray(ref),
                               rtol=2e-2, atol=2e-2)

    print("KERNEL_OK")
</pallas_src>

<mosaic_0001>
module attributes {stable_mosaic.version = 11 : i64} {
  func.func @_layernorm_kernel(%arg0: i32, %arg1: memref<16x128xf32, #tpu.memory_space<vmem>>, %arg2: memref<1x128xf32, #tpu.memory_space<vmem>>, %arg3: memref<1x128xf32, #tpu.memory_space<vmem>>, %arg4: memref<16x128xf32, #tpu.memory_space<vmem>>) attributes {dimension_semantics = [#tpu.dimension_semantics<parallel>], iteration_bounds = array<i64: 1>, scalar_prefetch = 0 : i64, scratch_operands = 0 : i64, tpu.core_type = #tpu.core_type<tc>, window_params = [{transform_indices = @transform_0, window_bounds = array<i64: 16, 128>}, {pipeline_mode = #tpu.pipeline_mode<synchronous>, transform_indices = @transform_1, window_bounds = array<i64: 1, 128>}, {pipeline_mode = #tpu.pipeline_mode<synchronous>, transform_indices = @transform_2, window_bounds = array<i64: 1, 128>}, {transform_indices = @transform_3, window_bounds = array<i64: 16, 128>}]} {
    %c0 = arith.constant 0 : index
    %c0_0 = arith.constant 0 : index
    %0 = vector.load %arg1[%c0, %c0_0] : memref<16x128xf32, #tpu.memory_space<vmem>>, vector<16x128xf32>
    %cst = arith.constant dense<0.000000e+00> : vector<16xf32>
    %1 = vector.multi_reduction <add>, %0, %cst [1] : vector<16x128xf32> to vector<16xf32>
    %2 = vector.shape_cast %1 : vector<16xf32> to vector<16x1xf32>
    %cst_1 = arith.constant 7.812500e-03 : f32
    %3 = vector.broadcast %cst_1 : f32 to vector<16x1xf32>
    %4 = arith.mulf %2, %3 : vector<16x1xf32>
    %5 = vector.broadcast %4 : vector<16x1xf32> to vector<16x128xf32>
    %6 = arith.subf %0, %5 : vector<16x128xf32>
    %7 = arith.mulf %6, %6 : vector<16x128xf32>
    %cst_2 = arith.constant dense<0.000000e+00> : vector<16xf32>
    %8 = vector.multi_reduction <add>, %7, %cst_2 [1] : vector<16x128xf32> to vector<16xf32>
    %9 = vector.shape_cast %8 : vector<16xf32> to vector<16x1xf32>
    %cst_3 = arith.constant 7.812500e-03 : f32
    %10 = vector.broadcast %cst_3 : f32 to vector<16x1xf32>
    %11 = arith.mulf %9, %10 : vector<16x1xf32>
    %cst_4 = arith.constant 9.99999974E-6 : f32
    %12 = vector.broadcast %cst_4 : f32 to vector<16x1xf32>
    %13 = arith.addf %11, %12 : vector<16x1xf32>
    %14 = math.rsqrt %13 : vector<16x1xf32>
    %15 = vector.broadcast %14 : vector<16x1xf32> to vector<16x128xf32>
    %16 = arith.mulf %6, %15 : vector<16x128xf32>
    %c0_5 = arith.constant 0 : index
    %c0_6 = arith.constant 0 : index
    %17 = vector.load %arg2[%c0_5, %c0_6] : memref<1x128xf32, #tpu.memory_space<vmem>>, vector<1x128xf32>
    %18 = vector.broadcast %17 : vector<1x128xf32> to vector<16x128xf32>
    %19 = arith.mulf %16, %18 : vector<16x128xf32>
    %c0_7 = arith.constant 0 : index
    %c0_8 = arith.constant 0 : index
    %20 = vector.load %arg3[%c0_7, %c0_8] : memref<1x128xf32, #tpu.memory_space<vmem>>, vector<1x128xf32>
    %21 = vector.broadcast %20 : vector<1x128xf32> to vector<16x128xf32>
    %22 = arith.addf %19, %21 : vector<16x128xf32>
    %c0_9 = arith.constant 0 : index
    %c0_10 = arith.constant 0 : index
    %23 = vector.load %arg4[%c0_9, %c0_10] : memref<16x128xf32, #tpu.memory_space<vmem>>, vector<16x128xf32>
    tpu.vector_store %arg4[%c0_9, %c0_10], %22 {strides = array<i32>} : memref<16x128xf32, #tpu.memory_space<vmem>>, vector<16x128xf32>,
    return
  }
  func.func @transform_0(%arg0: i32) -> (i32, i32) {
    %c0_i32 = arith.constant 0 : i32
    %c0_i32_0 = arith.constant 0 : i32
    return %arg0, %c0_i32 : i32, i32
  }
  func.func @transform_1(%arg0: i32) -> (i32, i32) {
    %c0_i32 = arith.constant 0 : i32
    %c0_i32_0 = arith.constant 0 : i32
    %c0_i32_1 = arith.constant 0 : i32
    return %c0_i32, %c0_i32_0 : i32, i32
  }
  func.func @transform_2(%arg0: i32) -> (i32, i32) {
    %c0_i32 = arith.constant 0 : i32
    %c0_i32_0 = arith.constant 0 : i32
    %c0_i32_1 = arith.constant 0 : i32
    return %c0_i32, %c0_i32_0 : i32, i32
  }
  func.func @transform_3(%arg0: i32) -> (i32, i32) {
    %c0_i32 = arith.constant 0 : i32
    %c0_i32_0 = arith.constant 0 : i32
    return %arg0, %c0_i32 : i32, i32
  }
}

</mosaic_0001>

<bundles_post_ra>
// kernel: tpu_custom_call.1
= control target key start
LH: loop header
LB: loop body
LE: loop exit
PB: predicated region body
PF: predicated region fallthrough
CT: control target
= control target key end

     0   :  { %8 = vsyncpa [#allocation3], 0  ;;  %s253_s0 = inlined_call_operand.hbm [shape: f32[16,128], index: 0, kind: input, shape index: {}]   ;;  %s254_s1 = inlined_call_operand.hbm [shape: f32[1,128], index: 1, kind: input, shape index: {}]   ;;  %s255_s2 = inlined_call_operand.vmem [shape: f32[1,128], index: 2, kind: input, shape index: {}]   ;;  %s256_s3 = inlined_call_operand.hbm [shape: f32[16,128], index: 3, kind: output, shape index: {}]  }
   0x1   :  { %9 = vsyncpa [#allocation6], 0 }
   0x2   :  { %10 = vsyncpa [#allocation4], 0  ;;  %s15_s14 = sshll.u32 %s253_s0, 4  ;;  %s210_s15 = smov [#allocation2]   ;;  %s16_s14 = int_to_ptr.hbm [resolvable:$true] %s15_s14 }
   0x3   :  { %s17_s16 = sshll.u32 %s210_s15, 4  ;;  %s29_s19 = sshll.u32 %s254_s1, 4  ;;  %s18_s16 = int_to_ptr.vmem [resolvable:$true] %s17_s16  ;;  %s30_s19 = int_to_ptr.hbm [resolvable:$true] %s29_s19 }
   0x4   :  { %s211_s20 = smov 128   ;;  %s212_s21 = smov 8  }
   0x5   :  { %23 = dma.hbm_to_vmem [thread:$0]  %s16_s14, 256, %s18_s16, [#allocation3], %s211_s20, %s211_s20, %s212_s21  }
   0x6   :  { %s213_s22 = smov [#allocation5]  }
   0x7   :  { %s31_s23 = sshll.u32 %s213_s22, 4  ;;  %s32_s23 = int_to_ptr.vmem [resolvable:$true] %s31_s23 }
   0x8   :  { %34 = dma.hbm_to_vmem [thread:$0]  %s30_s19, 16, %s32_s23, [#allocation6]  }
   0x9   :  { %204 = dma.done.wait [#allocation3], 256  }
   0xa   :  { %205 = vsyncadd [#allocation3], 4294967040 }
   0xb   :  { %206 = dma.done.wait [#allocation6], 16  }
   0xc   :  { %207 = vsyncadd [#allocation6], 4294967280  ;;  %v45_v0 = vld [vmem:[#allocation2] sm:$0xff]  ;;  %v46_v1 = vld [vmem:[#allocation2 + $0x8] sm:$0xff]  ;;  %s214_s24 = smov [#allocation7]   ;;  %s107_s28 = sshll.u32 %s256_s3, 4  ;;  %s108_s28 = int_to_ptr.hbm [resolvable:$true] %s107_s28 }
   0xd   :  { %47 = vadd.xlane.f32.xlu0 %v45_v0  ;;  %v126_v24 = vld [vmem:[#allocation5] ss:$0 sm:$0xff]  ;;  %v127_v28 = vld [vmem:[%s255_s2] ss:$0 sm:$0xff]  ;;  %s105_s25 = sshll.u32 %s214_s24, 4  ;;  %s106_s25 = int_to_ptr.vmem [resolvable:$true] %s105_s25 }
  0x15   :  { %49 = vadd.xlane.f32.xlu0 %v46_v1 }
  0x80   :  { %v48_v2 = vpop.xlane.xlu0 %47 }
  0x81   :  { %v51_v3 = vmul.f32 0.0078125, %v48_v2 }
  0x83   :  { %v53_v4 = vsub.f32 %v45_v0, %v51_v3 }
  0x85   :  { %v55_v5 = vmul.f32 %v53_v4, %v53_v4 }
  0x87   :  { %57 = vadd.xlane.f32.xlu1 %v55_v5 }
  0x88   :  { %v50_v6 = vpop.xlane.xlu0 %49 }
  0x89   :  { %v52_v7 = vmul.f32 0.0078125, %v50_v6 }
  0x8b   :  { %v54_v8 = vsub.f32 %v46_v1, %v52_v7 }
  0x8d   :  { %v56_v9 = vmul.f32 %v54_v8, %v54_v8 }
  0x8f   :  { %59 = vadd.xlane.f32.xlu1 %v56_v9 }
  0xfa   :  { %v58_v10 = vpop.xlane.xlu1 %57 }
  0xfb   :  { %v61_v11 = vmul.f32 0.0078125, %v58_v10 }
  0xfd   :  { %v63_v12 = vadd.f32 1e-05, %v61_v11 }
  0xff   :  { %128 = vrsqrt.f32 %v63_v12  ;;  %vm71_vm1 = vweird.f32 %v63_v12 }
 0x102   :  { %v60_v13 = vpop.xlane.xlu1 %59 }
 0x103   :  { %v62_v14 = vmul.f32 0.0078125, %v60_v13 }
 0x105   :  { %v129_v15 = vpop.eup %128  ;;  %v64_v16 = vadd.f32 1e-05, %v62_v14 }
 0x106   :  { %v66_v17 = vmul.f32 %v129_v15, %v63_v12  ;;  %vm72_vm0 = vweird.f32 %v129_v15 }
 0x107   :  { %130 = vrsqrt.f32 %v64_v16  ;;  %vm73_vm2 = vmor %vm71_vm1, %vm72_vm0  ;;  %vm81_vm4 = vweird.f32 %v64_v16 }
 0x108   :  { %v67_v18 = vmul.f32 %v129_v15, %v66_v17 }
 0x10a   :  { %v68_v19 = vmul.f32 0.5, %v67_v18 }
 0x10c   :  { %v69_v20 = vsub.f32 1.5, %v68_v19 }
 0x10d   :  { %v131_v21 = vpop.eup %130 }
 0x10e   :  { %v70_v22 = vmul.f32 %v129_v15, %v69_v20  ;;  %v76_v23 = vmul.f32 %v131_v21, %v64_v16  ;;  %vm82_vm3 = vweird.f32 %v131_v21 }
 0x10f   :  { %vm83_vm5 = vmor %vm81_vm4, %vm82_vm3 }
 0x110   :  { %v74_v25 = vsel %vm73_vm2, %v129_v15, %v70_v22  ;;  %v77_v26 = vmul.f32 %v131_v21, %v76_v23 }
 0x111   :  { %v85_v27 = vmul.f32 %v74_v25, %v53_v4 }
 0x112   :  { %v78_v29 = vmul.f32 0.5, %v77_v26 }
 0x113   :  { %v91_v30 = vmul.f32 %v126_v24, %v85_v27 }
 0x114   :  { %v79_v31 = vsub.f32 1.5, %v78_v29 }
 0x115   :  { %v97_v32 = vadd.f32 %v127_v28, %v91_v30 }
 0x116   :  { %v80_v33 = vmul.f32 %v131_v21, %v79_v31 }
 0x117   :  { %99 = vst [vmem:[#allocation7] sm:$0xff] %v97_v32 }
 0x118   :  { %v84_v34 = vsel %vm83_vm5, %v131_v21, %v80_v33 }
 0x119   :  { %v86_v35 = vmul.f32 %v84_v34, %v54_v8 }
 0x11b   :  { %v92_v36 = vmul.f32 %v126_v24, %v86_v35 }
 0x11d   :  { %v98_v37 = vadd.f32 %v127_v28, %v92_v36 }
 0x11f   :  { %100 = vst [vmem:[#allocation7 + $0x8] sm:$0xff] %v98_v37 }
 0x120   :  { %113 = dma.vmem_to_hbm [thread:$0]  %s106_s25, 256, %s108_s28, [#allocation4], %s211_s20, %s211_s20, %s212_s21  }
 0x121   :  { %208 = dma.done.wait [#allocation4], 256  }
 0x122   :  { %209 = vsyncadd [#allocation4], 4294967040 }
 0x123   :  { %118 = vsyncpa [#allocation3], 1 }
 0x124   :  { %119 = vsyncpa [#allocation6], 1 }
 0x125   :  { %120 = vsyncpa [#allocation4], 1 }

</bundles_post_ra>
